<compile_context>
chip_gen: v7x
topology: tpu7x:2x2x1
jax: 0.10.0
libtpu: 0.0.40
codegen_flags: <defaults>
</compile_context>

<pallas_src>
import functools

import jax
import jax.numpy as jnp
from jax.experimental import pallas as pl
from jax.experimental.pallas import tpu as pltpu

# ---- small stand-in shapes (original: img_size=784, hidden=300) ----
SEQ = 8
BATCH = 2
IMG_SIZE = 16
N_CLASSES = 10
D_IN = IMG_SIZE + N_CLASSES      # cat([x, label_onehot], dim=2)
HIDDEN = 32                      # 4*HIDDEN = 128 -> gates fill one lane dim exactly
NUM_LAYERS = 2                   # 2-layer LSTM, as in the PyTorch module


def _modeld_kernel(x2d_ref, oh2d_ref,            # (T*B, IMG) bf16, (T*B, 10) bf16
                   wx_ref, wlab_ref, b0_ref,     # (IMG,4H) bf16, (10,4H) bf16, (1,4H) f32
                   wbig_ref, b1_ref,             # (2H,8H) f32 = [[whh0,wih1],[0,whh1]], (1,4H) f32
                   wmlp_ref, bmlp_ref,           # (1,H) f32, (1,1) f32
                   y_ref,                        # (B,1) f32
                   *, steps, batch):
    """2-layer LSTM (truncated to the observable timesteps) + last-batch gather
    + ReLU + Linear(H,1) + sigmoid, all fused in one latency-bound kernel."""
    H = HIDDEN
    T = steps
    B = batch

    # --- hoisted layer-1 input projection for the T observable timesteps ---
    # bf16 operands, f32 accumulation; folded bias (b_ih0 + b_hh0) added once.
    xg_all = (jnp.dot(x2d_ref[...], wx_ref[...], preferred_element_type=jnp.float32)
              + jnp.dot(oh2d_ref[...], wlab_ref[...], preferred_element_type=jnp.float32)
              + b0_ref[...])                               # (T*B, 4H) f32

    wbig = wbig_ref[...]                                   # (2H, 8H), loop-invariant RHS
    b1 = jnp.broadcast_to(b1_ref[...], (B, 4 * H))         # hoisted broadcast (no CSE in loop)
    wmlp = wmlp_ref[...]                                   # (1, H)
    bmlp = bmlp_ref[...]                                   # (1, 1)

    def gate_act(g):
        # Gate columns were permuted in the wrapper to [i, f, o | g]:
        # sigmoid on the first 3H lanes only, tanh on the last H only.
        sig = jax.nn.sigmoid(g[:, :3 * H])
        gg = jnp.tanh(g[:, 3 * H:])
        return sig[:, 0:H], sig[:, H:2 * H], sig[:, 2 * H:3 * H], gg   # i, f, o, g

    # zero initial hidden/cell states (PyTorch default), loop-carried as values
    zeros = jnp.zeros((B, H), jnp.float32)
    c1, h2, c2 = zeros, zeros, zeros
    g1hh = jnp.zeros((B, 4 * H), jnp.float32)   # h1_{-1} @ whh0 == 0
    y_vals = []

    # Fully unrolled time loop (T = B static) -> cross-step scheduling visibility.
    for t in range(T):
        # layer 1: hh contribution was produced by the previous step's fused matmul
        g1 = xg_all[t * B:(t + 1) * B, :] + g1hh
        i1, f1, o1, gg1 = gate_act(g1)
        c1 = f1 * c1 + i1 * gg1
        h1 = o1 * jnp.tanh(c1)

        # Single fused matmul per step (static RHS): [h1_t | h2_{t-1}] @ W_big.
        # Left 4H cols  = h1_t @ whh0                   (g1 hh-term for step t+1)
        # Right 4H cols = h1_t @ wih1 + h2_{t-1} @ whh1 (g2_t, pre-bias)
        fused = jnp.dot(jnp.concatenate([h1, h2], axis=1), wbig,
                        preferred_element_type=jnp.float32)        # (B, 8H)
        g1hh = fused[:, :4 * H]
        g2 = fused[:, 4 * H:] + b1
        i2, f2, o2, gg2 = gate_act(g2)
        c2 = f2 * c2 + i2 * gg2
        h2 = o2 * jnp.tanh(c2)

        # outputs[:, -1, :] in PyTorch == layer-2 hidden of the LAST batch row;
        # inline ReLU + Linear(H, 1) on that single row (VPU mul + lane reduce).
        row = jnp.maximum(h2[B - 1:B, :], 0.0)                     # (1, H)
        y_vals.append(jnp.sum(row * wmlp, axis=1, keepdims=True) + bmlp)   # (1, 1)

    # res.narrow(0, 0, B) -> exactly the T = B rows we produced, then sigmoid.
    y_ref[...] = jax.nn.sigmoid(jnp.concatenate(y_vals, axis=0))   # (B, 1)


def init_params(key):
    """Deterministic PyTorch-style LSTM/Linear init (uniform +-1/sqrt(H)).

    Weights are stored transposed vs. PyTorch, i.e. (in_dim, 4H), with the
    standard PyTorch packed gate order [i, f, g, o] along the 4H axis; the
    wrapper applies the gate permutation / fusion."""
    k = 1.0 / float(jnp.sqrt(jnp.float32(HIDDEN)))
    keys = jax.random.split(key, 8)

    def u(kk, shape):
        return jax.random.uniform(kk, shape, jnp.float32, -k, k)

    return {
        "w_ih0": u(keys[0], (D_IN, 4 * HIDDEN)),
        "w_hh0": u(keys[1], (HIDDEN, 4 * HIDDEN)),
        "b0":    u(keys[2], (1, 4 * HIDDEN)),      # bias_ih_l0 + bias_hh_l0 folded
        "w_ih1": u(keys[3], (HIDDEN, 4 * HIDDEN)),
        "w_hh1": u(keys[4], (HIDDEN, 4 * HIDDEN)),
        "b1":    u(keys[5], (1, 4 * HIDDEN)),      # bias_ih_l1 + bias_hh_l1 folded
        "w_mlp": u(keys[6], (1, HIDDEN)),          # Linear(H, 1) weight (row vector)
        "b_mlp": u(keys[7], (1, 1)),
    }


def modeld_forward(x, label_onehot, params):
    # TODO(synk): GaussianNoise(0.3) only fires in training mode; eval-mode forward is identity.
    S, B, _ = x.shape
    assert B <= S, "res.narrow(0, 0, batch) in the PyTorch model requires batch <= seq"
    H = HIDDEN
    # Only timesteps t < B ever reach the output (res[:B] reads h2_t[B-1] for
    # t < B, and h2_t depends only on x_0..x_t) -> exact truncation.
    T = B

    # --- gate permutation [i, f, g, o] -> [i, f, o, g] on the 4H column axis ---
    perm = jnp.concatenate([jnp.arange(0, 2 * H),
                            jnp.arange(3 * H, 4 * H),
                            jnp.arange(2 * H, 3 * H)])

    def p4(w):
        return w[:, perm]

    # layer-1 input weights, split so no cat([x, onehot]) is materialized
    w_x = p4(params["w_ih0"][:IMG_SIZE, :]).astype(jnp.bfloat16)     # (IMG, 4H)
    w_lab = p4(params["w_ih0"][IMG_SIZE:, :]).astype(jnp.bfloat16)   # (10, 4H)
    b0 = p4(params["b0"])                                            # (1, 4H) f32

    # fused static block RHS for the per-step matmul: [[whh0, wih1], [0, whh1]]
    whh0 = p4(params["w_hh0"])
    wih1 = p4(params["w_ih1"])
    whh1 = p4(params["w_hh1"])
    w_big = jnp.concatenate(
        [jnp.concatenate([whh0, wih1], axis=1),
         jnp.concatenate([jnp.zeros_like(whh1), whh1], axis=1)],
        axis=0)                                                      # (2H, 8H)
    b1 = p4(params["b1"])                                            # (1, 4H)

    # only the first T timesteps are observable; bf16 matmul inputs (f32 acc)
    x2d = x[:T].reshape(T * B, IMG_SIZE).astype(jnp.bfloat16)        # (T*B, IMG)
    oh2d = label_onehot[:T].reshape(T * B, N_CLASSES).astype(jnp.bfloat16)

    vmem = pl.BlockSpec(memory_space=pltpu.MemorySpace.VMEM)
    kernel = functools.partial(_modeld_kernel, steps=T, batch=B)
    # Everything stays VMEM-resident; no grid / pipelining needed at these shapes.
    return pl.pallas_call(
        kernel,
        out_shape=jax.ShapeDtypeStruct((B, 1), jnp.float32),
        in_specs=[vmem] * 9,
        out_specs=vmem,
        compiler_params=pltpu.CompilerParams(vmem_limit_bytes=32 * 1024 * 1024),
    )(x2d, oh2d, w_x, w_lab, b0, w_big, b1, params["w_mlp"], params["b_mlp"])


if __name__ == "__main__":
    key = jax.random.PRNGKey(0)
    kx, kl, kp = jax.random.split(key, 3)

    x = jax.random.normal(kx, (SEQ, BATCH, IMG_SIZE), dtype=jnp.float32)
    labels = jax.random.randint(kl, (SEQ, BATCH), 0, N_CLASSES)
    label_onehot = jax.nn.one_hot(labels, N_CLASSES, dtype=jnp.float32)
    params = init_params(kp)

    y = modeld_forward(x, label_onehot, params)
    y = jax.block_until_ready(y)
    assert y.shape == (BATCH, 1), y.shape
    assert bool(jnp.all((y > 0.0) & (y < 1.0)))   # sigmoid range sanity check
    print("KERNEL_OK")
</pallas_src>

<mosaic_0001>
module attributes {stable_mosaic.version = 11 : i64} {
  func.func @_modeld_kernel(%arg0: memref<4x16xbf16, #tpu.memory_space<vmem>>, %arg1: memref<4x10xbf16, #tpu.memory_space<vmem>>, %arg2: memref<16x128xbf16, #tpu.memory_space<vmem>>, %arg3: memref<10x128xbf16, #tpu.memory_space<vmem>>, %arg4: memref<1x128xf32, #tpu.memory_space<vmem>>, %arg5: memref<64x256xf32, #tpu.memory_space<vmem>>, %arg6: memref<1x128xf32, #tpu.memory_space<vmem>>, %arg7: memref<1x32xf32, #tpu.memory_space<vmem>>, %arg8: memref<1x1xf32, #tpu.memory_space<vmem>>, %arg9: memref<2x1xf32, #tpu.memory_space<vmem>>) attributes {dimension_semantics = [], scalar_prefetch = 0 : i64, scratch_operands = 0 : i64, tpu.core_type = #tpu.core_type<tc>} {
    %c0 = arith.constant 0 : index
    %c0_0 = arith.constant 0 : index
    %0 = vector.load %arg0[%c0, %c0_0] : memref<4x16xbf16, #tpu.memory_space<vmem>>, vector<4x16xbf16>
    %c0_1 = arith.constant 0 : index
    %c0_2 = arith.constant 0 : index
    %1 = vector.load %arg2[%c0_1, %c0_2] : memref<16x128xbf16, #tpu.memory_space<vmem>>, vector<16x128xbf16>
    %cst = arith.constant dense<0.000000e+00> : vector<4x128xf32>
    %2 = tpu.matmul %0, %1, %cst {dimension_numbers = #tpu.dot_dimension_numbers<[1], [0], [0], [1], [0, 0, 1, 1], [], []>} : vector<4x16xbf16>, vector<16x128xbf16>, vector<4x128xf32> -> vector<4x128xf32>
    %c0_3 = arith.constant 0 : index
    %c0_4 = arith.constant 0 : index
    %3 = vector.load %arg1[%c0_3, %c0_4] : memref<4x10xbf16, #tpu.memory_space<vmem>>, vector<4x10xbf16>
    %c0_5 = arith.constant 0 : index
    %c0_6 = arith.constant 0 : index
    %4 = vector.load %arg3[%c0_5, %c0_6] : memref<10x128xbf16, #tpu.memory_space<vmem>>, vector<10x128xbf16>
    %cst_7 = arith.constant dense<0.000000e+00> : vector<4x128xf32>
    %5 = tpu.matmul %3, %4, %cst_7 {dimension_numbers = #tpu.dot_dimension_numbers<[1], [0], [0], [1], [0, 0, 1, 1], [], []>} : vector<4x10xbf16>, vector<10x128xbf16>, vector<4x128xf32> -> vector<4x128xf32>
    %6 = arith.addf %2, %5 : vector<4x128xf32>
    %c0_8 = arith.constant 0 : index
    %c0_9 = arith.constant 0 : index
    %7 = vector.load %arg4[%c0_8, %c0_9] : memref<1x128xf32, #tpu.memory_space<vmem>>, vector<1x128xf32>
    %8 = vector.broadcast %7 : vector<1x128xf32> to vector<4x128xf32>
    %9 = arith.addf %6, %8 : vector<4x128xf32>
    %c0_10 = arith.constant 0 : index
    %c0_11 = arith.constant 0 : index
    %10 = vector.load %arg5[%c0_10, %c0_11] : memref<64x256xf32, #tpu.memory_space<vmem>>, vector<64x256xf32>
    %c0_12 = arith.constant 0 : index
    %c0_13 = arith.constant 0 : index
    %11 = vector.load %arg6[%c0_12, %c0_13] : memref<1x128xf32, #tpu.memory_space<vmem>>, vector<1x128xf32>
    %12 = vector.shape_cast %11 : vector<1x128xf32> to vector<1x128xf32>
    %13 = vector.broadcast %12 : vector<1x128xf32> to vector<2x128xf32>
    %c0_14 = arith.constant 0 : index
    %c0_15 = arith.constant 0 : index
    %14 = vector.load %arg7[%c0_14, %c0_15] : memref<1x32xf32, #tpu.memory_space<vmem>>, vector<1x32xf32>
    %c0_16 = arith.constant 0 : index
    %c0_17 = arith.constant 0 : index
    %15 = vector.load %arg8[%c0_16, %c0_17] : memref<1x1xf32, #tpu.memory_space<vmem>>, vector<1x1xf32>
    %cst_18 = arith.constant 0.000000e+00 : f32
    %16 = vector.broadcast %cst_18 : f32 to vector<2x32xf32>
    %cst_19 = arith.constant 0.000000e+00 : f32
    %17 = vector.broadcast %cst_19 : f32 to vector<2x128xf32>
    %18 = vector.extract_strided_slice %9 {offsets = [0, 0], sizes = [2, 128], strides = [1, 1]} : vector<4x128xf32> to vector<2x128xf32>
    %19 = arith.addf %18, %17 : vector<2x128xf32>
    %20 = vector.extract_strided_slice %19 {offsets = [0, 0], sizes = [2, 96], strides = [1, 1]} : vector<2x128xf32> to vector<2x96xf32>
    %21 = arith.negf %20 : vector<2x96xf32>
    %22 = math.exp %21 : vector<2x96xf32>
    %cst_20 = arith.constant 1.000000e+00 : f32
    %23 = vector.broadcast %cst_20 : f32 to vector<2x96xf32>
    %24 = arith.addf %23, %22 : vector<2x96xf32>
    %25 = arith.divf %23, %24 : vector<2x96xf32>
    %26 = vector.extract_strided_slice %19 {offsets = [0, 96], sizes = [2, 32], strides = [1, 1]} : vector<2x128xf32> to vector<2x32xf32>
    %27 = math.tanh %26 : vector<2x32xf32>
    %28 = vector.extract_strided_slice %25 {offsets = [0, 0], sizes = [2, 32], strides = [1, 1]} : vector<2x96xf32> to vector<2x32xf32>
    %29 = vector.extract_strided_slice %25 {offsets = [0, 32], sizes = [2, 32], strides = [1, 1]} : vector<2x96xf32> to vector<2x32xf32>
    %30 = vector.extract_strided_slice %25 {offsets = [0, 64], sizes = [2, 32], strides = [1, 1]} : vector<2x96xf32> to vector<2x32xf32>
    %31 = arith.mulf %29, %16 : vector<2x32xf32>
    %32 = arith.mulf %28, %27 : vector<2x32xf32>
    %33 = arith.addf %31, %32 : vector<2x32xf32>
    %34 = math.tanh %33 : vector<2x32xf32>
    %35 = arith.mulf %30, %34 : vector<2x32xf32>
    %36 = tpu.concatenate %35, %16 in 1 : vector<2x32xf32>, vector<2x32xf32> -> vector<2x64xf32>
    %cst_21 = arith.constant dense<0.000000e+00> : vector<2x256xf32>
    %37 = tpu.matmul %36, %10, %cst_21 {dimension_numbers = #tpu.dot_dimension_numbers<[1], [0], [0], [1], [0, 0, 1, 1], [], []>} : vector<2x64xf32>, vector<64x256xf32>, vector<2x256xf32> -> vector<2x256xf32>
    %38 = vector.extract_strided_slice %37 {offsets = [0, 0], sizes = [2, 128], strides = [1, 1]} : vector<2x256xf32> to vector<2x128xf32>
    %39 = vector.extract_strided_slice %37 {offsets = [0, 128], sizes = [2, 128], strides = [1, 1]} : vector<2x256xf32> to vector<2x128xf32>
    %40 = arith.addf %39, %13 : vector<2x128xf32>
    %41 = vector.extract_strided_slice %40 {offsets = [0, 0], sizes = [2, 96], strides = [1, 1]} : vector<2x128xf32> to vector<2x96xf32>
    %42 = arith.negf %41 : vector<2x96xf32>
    %43 = math.exp %42 : vector<2x96xf32>
    %cst_22 = arith.constant 1.000000e+00 : f32
    %44 = vector.broadcast %cst_22 : f32 to vector<2x96xf32>
    %45 = arith.addf %44, %43 : vector<2x96xf32>
    %46 = arith.divf %44, %45 : vector<2x96xf32>
    %47 = vector.extract_strided_slice %40 {offsets = [0, 96], sizes = [2, 32], strides = [1, 1]} : vector<2x128xf32> to vector<2x32xf32>
    %48 = math.tanh %47 : vector<2x32xf32>
    %49 = vector.extract_strided_slice %46 {offsets = [0, 0], sizes = [2, 32], strides = [1, 1]} : vector<2x96xf32> to vector<2x32xf32>
    %50 = vector.extract_strided_slice %46 {offsets = [0, 32], sizes = [2, 32], strides = [1, 1]} : vector<2x96xf32> to vector<2x32xf32>
    %51 = vector.extract_strided_slice %46 {offsets = [0, 64], sizes = [2, 32], strides = [1, 1]} : vector<2x96xf32> to vector<2x32xf32>
    %52 = arith.mulf %50, %16 : vector<2x32xf32>
    %53 = arith.mulf %49, %48 : vector<2x32xf32>
    %54 = arith.addf %52, %53 : vector<2x32xf32>
    %55 = math.tanh %54 : vector<2x32xf32>
    %56 = arith.mulf %51, %55 : vector<2x32xf32>
    %57 = vector.extract_strided_slice %56 {offsets = [1, 0], sizes = [1, 32], strides = [1, 1]} : vector<2x32xf32> to vector<1x32xf32>
    %cst_23 = arith.constant 0.000000e+00 : f32
    %58 = vector.broadcast %cst_23 : f32 to vector<1x32xf32>
    %59 = arith.maximumf %57, %58 : vector<1x32xf32>
    %60 = arith.mulf %59, %14 : vector<1x32xf32>
    %cst_24 = arith.constant dense<0.000000e+00> : vector<1xf32>
    %61 = vector.multi_reduction <add>, %60, %cst_24 [1] : vector<1x32xf32> to vector<1xf32>
    %62 = vector.shape_cast %61 : vector<1xf32> to vector<1x1xf32>
    %63 = arith.addf %62, %15 : vector<1x1xf32>
    %64 = vector.extract_strided_slice %9 {offsets = [2, 0], sizes = [2, 128], strides = [1, 1]} : vector<4x128xf32> to vector<2x128xf32>
    %65 = arith.addf %64, %38 : vector<2x128xf32>
    %66 = vector.extract_strided_slice %65 {offsets = [0, 0], sizes = [2, 96], strides = [1, 1]} : vector<2x128xf32> to vector<2x96xf32>
    %67 = arith.negf %66 : vector<2x96xf32>
    %68 = math.exp %67 : vector<2x96xf32>
    %cst_25 = arith.constant 1.000000e+00 : f32
    %69 = vector.broadcast %cst_25 : f32 to vector<2x96xf32>
    %70 = arith.addf %69, %68 : vector<2x96xf32>
    %71 = arith.divf %69, %70 : vector<2x96xf32>
    %72 = vector.extract_strided_slice %65 {offsets = [0, 96], sizes = [2, 32], strides = [1, 1]} : vector<2x128xf32> to vector<2x32xf32>
    %73 = math.tanh %72 : vector<2x32xf32>
    %74 = vector.extract_strided_slice %71 {offsets = [0, 0], sizes = [2, 32], strides = [1, 1]} : vector<2x96xf32> to vector<2x32xf32>
    %75 = vector.extract_strided_slice %71 {offsets = [0, 32], sizes = [2, 32], strides = [1, 1]} : vector<2x96xf32> to vector<2x32xf32>
    %76 = vector.extract_strided_slice %71 {offsets = [0, 64], sizes = [2, 32], strides = [1, 1]} : vector<2x96xf32> to vector<2x32xf32>
    %77 = arith.mulf %75, %33 : vector<2x32xf32>
    %78 = arith.mulf %74, %73 : vector<2x32xf32>
    %79 = arith.addf %77, %78 : vector<2x32xf32>
    %80 = math.tanh %79 : vector<2x32xf32>
    %81 = arith.mulf %76, %80 : vector<2x32xf32>
    %82 = tpu.concatenate %81, %56 in 1 : vector<2x32xf32>, vector<2x32xf32> -> vector<2x64xf32>
    %cst_26 = arith.constant dense<0.000000e+00> : vector<2x256xf32>
    %83 = tpu.matmul %82, %10, %cst_26 {dimension_numbers = #tpu.dot_dimension_numbers<[1], [0], [0], [1], [0, 0, 1, 1], [], []>} : vector<2x64xf32>, vector<64x256xf32>, vector<2x256xf32> -> vector<2x256xf32>
    %84 = vector.extract_strided_slice %83 {offsets = [0, 128], sizes = [2, 128], strides = [1, 1]} : vector<2x256xf32> to vector<2x128xf32>
    %85 = arith.addf %84, %13 : vector<2x128xf32>
    %86 = vector.extract_strided_slice %85 {offsets = [0, 0], sizes = [2, 96], strides = [1, 1]} : vector<2x128xf32> to vector<2x96xf32>
    %87 = arith.negf %86 : vector<2x96xf32>
    %88 = math.exp %87 : vector<2x96xf32>
    %cst_27 = arith.constant 1.000000e+00 : f32
    %89 = vector.broadcast %cst_27 : f32 to vector<2x96xf32>
    %90 = arith.addf %89, %88 : vector<2x96xf32>
    %91 = arith.divf %89, %90 : vector<2x96xf32>
    %92 = vector.extract_strided_slice %85 {offsets = [0, 96], sizes = [2, 32], strides = [1, 1]} : vector<2x128xf32> to vector<2x32xf32>
    %93 = math.tanh %92 : vector<2x32xf32>
    %94 = vector.extract_strided_slice %91 {offsets = [0, 0], sizes = [2, 32], strides = [1, 1]} : vector<2x96xf32> to vector<2x32xf32>
    %95 = vector.extract_strided_slice %91 {offsets = [0, 32], sizes = [2, 32], strides = [1, 1]} : vector<2x96xf32> to vector<2x32xf32>
    %96 = vector.extract_strided_slice %91 {offsets = [0, 64], sizes = [2, 32], strides = [1, 1]} : vector<2x96xf32> to vector<2x32xf32>
    %97 = arith.mulf %95, %54 : vector<2x32xf32>
    %98 = arith.mulf %94, %93 : vector<2x32xf32>
    %99 = arith.addf %97, %98 : vector<2x32xf32>
    %100 = math.tanh %99 : vector<2x32xf32>
    %101 = arith.mulf %96, %100 : vector<2x32xf32>
    %102 = vector.extract_strided_slice %101 {offsets = [1, 0], sizes = [1, 32], strides = [1, 1]} : vector<2x32xf32> to vector<1x32xf32>
    %cst_28 = arith.constant 0.000000e+00 : f32
    %103 = vector.broadcast %cst_28 : f32 to vector<1x32xf32>
    %104 = arith.maximumf %102, %103 : vector<1x32xf32>
    %105 = arith.mulf %104, %14 : vector<1x32xf32>
    %cst_29 = arith.constant dense<0.000000e+00> : vector<1xf32>
    %106 = vector.multi_reduction <add>, %105, %cst_29 [1] : vector<1x32xf32> to vector<1xf32>
    %107 = vector.shape_cast %106 : vector<1xf32> to vector<1x1xf32>
    %108 = arith.addf %107, %15 : vector<1x1xf32>
    %109 = tpu.concatenate %63, %108 in 0 : vector<1x1xf32>, vector<1x1xf32> -> vector<2x1xf32>
    %110 = arith.negf %109 : vector<2x1xf32>
    %111 = math.exp %110 : vector<2x1xf32>
    %cst_30 = arith.constant 1.000000e+00 : f32
    %112 = vector.broadcast %cst_30 : f32 to vector<2x1xf32>
    %113 = arith.addf %112, %111 : vector<2x1xf32>
    %114 = arith.divf %112, %113 : vector<2x1xf32>
    %c0_31 = arith.constant 0 : index
    %c0_32 = arith.constant 0 : index
    %115 = vector.load %arg9[%c0_31, %c0_32] : memref<2x1xf32, #tpu.memory_space<vmem>>, vector<2x1xf32>
    tpu.vector_store %arg9[%c0_31, %c0_32], %114 {strides = array<i32>} : memref<2x1xf32, #tpu.memory_space<vmem>>, vector<2x1xf32>,
    return
  }
}

</mosaic_0001>

<bundles_post_ra>
// kernel: tpu_custom_call.1
= control target key start
LH: loop header
LB: loop body
LE: loop exit
PB: predicated region body
PF: predicated region fallthrough
CT: control target
= control target key end

     0   :  { %s873_s0 = inlined_call_operand.vmem [shape: bf16[4,16], index: 0, kind: input, shape index: {}]   ;;  %s874_s1 = inlined_call_operand.hbm [shape: bf16[4,10], index: 1, kind: input, shape index: {}]   ;;  %s875_s2 = inlined_call_operand.vmem [shape: bf16[16,128], index: 2, kind: input, shape index: {}]   ;;  %s876_s3 = inlined_call_operand.hbm [shape: bf16[10,128], index: 3, kind: input, shape index: {}]   ;;  %s877_s4 = inlined_call_operand.vmem [shape: f32[1,128], index: 4, kind: input, shape index: {}]   ;;  %s878_s5 = inlined_call_operand.hbm [shape: f32[64,256], index: 5, kind: input, shape index: {}]   ;;  %s879_s6 = inlined_call_operand.vmem [shape: f32[1,128], index: 6, kind: input, shape index: {}]   ;;  %s880_s7 = inlined_call_operand.vmem [shape: f32[1,32], index: 7, kind: input, shape index: {}]   ;;  %s881_s8 = inlined_call_operand.<no memory space> [shape: f32[1,1], index: 8, kind: input, shape index: {}]   ;;  %s882_s9 = inlined_call_operand.vmem [shape: f32[2,1], index: 9, kind: output, shape index: {}]  }
   0x1   :  { %v14_v0 = vstv %s881_s8 }
   0x2   :  { %15 = vst [vmem:[#allocation2] sm:$0x1] %v14_v0 }
   0x3   :  { %16 = vsyncpa [#allocation4], 0 }
   0x4   :  { %17 = vsyncpa [#allocation6], 0  ;;  %s723_s11 = smov [#allocation5]   ;;  %s653_s15 = scalar_lea.hbm %s876_s3, 128 }
   0x5   :  { %s37_s12 = sshll.u32 %s723_s11, 4  ;;  %p654_p0 = scmp.ne.s32.totalorder %s876_s3, %s653_s15  ;;  %s38_s12 = int_to_ptr.vmem [resolvable:$true] %s37_s12 }
   0x6   :  { %p657_p1 = scmp.lt.u32.totalorder %s653_s15, %s876_s3 }
   0x8   :  { %p659_p2 = pnand %p657_p1, %p654_p0 }
   0xa   :  { %662 = shalt.err (!%p659_p2)
}
   0xb   :  { %s663_s8 = scalar_lea.vmem %s38_s12, 128  ;;  %p668_p4 = scmp.lt.s32.totalorder %s38_s12, %s38_s12 }
   0xc   :  { %p664_p3 = scmp.ne.s32.totalorder %s38_s12, %s663_s8  ;;  %p669_p5 = scmp.lt.s32.totalorder %s663_s8, %s663_s8 }
   0xe   :  { %p670_p6 = por %p669_p5, %p668_p4 }
  0x10   :  { %p671_p7 = pnand %p670_p6, %p664_p3 }
  0x12   :  { %674 = shalt.err (!%p671_p7)
}
  0x13   :  { %s724_s20 = smov 64   ;;  %s725_s21 = smov 4  }
  0x14   :  { %43 = dma.hbm_to_vmem [thread:$0]  %s876_s3, 128, %s38_s12, [#allocation6], %s724_s20, %s724_s20, %s725_s21  }
  0x15   :  { %s726_s24 = smov [#allocation3]   ;;  %s727_s26 = smov [#allocation7]  }
  0x16   :  { %s26_s25 = sshll.u32 %s726_s24, 4  ;;  %s51_s27 = sshll.u32 %s727_s26, 4  ;;  %s27_s25 = int_to_ptr.vmem [resolvable:$true] %s26_s25  ;;  %s52_s27 = int_to_ptr.vmem [resolvable:$true] %s51_s27 }
  0x17   :  { %s675_s30 = scalar_lea.hbm %s874_s1, 32 }
  0x18   :  { %p676_p8 = scmp.ne.s32.totalorder %s874_s1, %s675_s30  ;;  %p679_p9 = scmp.lt.u32.totalorder %s675_s30, %s874_s1 }
  0x1a   :  { %p681_p10 = pnand %p679_p9, %p676_p8 }
  0x1c   :  { %684 = shalt.err (!%p681_p10)
}
  0x1d   :  { %s685_s3 = scalar_lea.vmem %s27_s25, 32  ;;  %p690_p12 = scmp.lt.s32.totalorder %s27_s25, %s27_s25 }
  0x1e   :  { %p686_p11 = scmp.ne.s32.totalorder %s27_s25, %s685_s3  ;;  %p691_p13 = scmp.lt.s32.totalorder %s685_s3, %s685_s3 }
  0x20   :  { %p692_p0 = por %p691_p13, %p690_p12 }
  0x22   :  { %p693_p1 = pnand %p692_p0, %p686_p11 }
  0x24   :  { %696 = shalt.err (!%p693_p1)
}
  0x25   :  { %29 = dma.hbm_to_vmem [thread:$0]  %s874_s1, 32, %s27_s25, [#allocation4]  }
  0x26   :  { %s697_s18 = scalar_lea.hbm %s878_s5, 2048 }
  0x27   :  { %p698_p2 = scmp.ne.s32.totalorder %s878_s5, %s697_s18  ;;  %p701_p3 = scmp.lt.u32.totalorder %s697_s18, %s878_s5 }
  0x29   :  { %p703_p4 = pnand %p701_p3, %p698_p2 }
  0x2b   :  { %706 = shalt.err (!%p703_p4)
}
  0x2c   :  { %s707_s23 = scalar_lea.vmem %s52_s27, 2048  ;;  %p712_p6 = scmp.lt.s32.totalorder %s52_s27, %s52_s27 }
  0x2d   :  { %p708_p5 = scmp.ne.s32.totalorder %s52_s27, %s707_s23  ;;  %p713_p7 = scmp.lt.s32.totalorder %s707_s23, %s707_s23 }
  0x2f   :  { %p714_p8 = por %p713_p7, %p712_p6 }
  0x31   :  { %p715_p9 = pnand %p714_p8, %p708_p5 }
  0x33   :  { %718 = shalt.err (!%p715_p9)
}
  0x34   :  { %s728_s1 = smov 256   ;;  %s729_s24 = smov 16  }
  0x35   :  { %57 = dma.hbm_to_vmem [thread:$0]  %s878_s5, 2048, %s52_s27, [#allocation6], %s728_s1, %s728_s1, %s729_s24  }
  0x36   :  { %719 = dma.done.wait [#allocation4], 32  }
  0x37   :  { %720 = vsyncadd [#allocation4], 4294967264 }
  0x38   :  { %721 = dma.done.wait [#allocation6], 2176  }
  0x39   :  { %722 = vsyncadd [#allocation6], 4294965120  ;;  %v730_v1 = vmov 0.0   ;;  %vm731_vm0 = vmmov 0   ;;  %v615_v2 = vld [vmem:[%s875_s2] sm:$0xff]   ;;  %vm89_vm1 = vcmask 1044480  }
  0x3a   :  { %566 = vmatprep.subr.bf16.mxu1 %v730_v1  ;;  %560 = vmatprep.subr.bf16.mxu0 %v730_v1  ;;  %v616_v3 = vld [vmem:[#allocation5] sm:$0x1f]   ;;  %v74_v4 = vld [vmem:[%s873_s0] sm:$0x3]  ;;  %vm139_vm2 = vcmask 130048   ;;  %vm85_vm3 = vcmask 80896  }
  0x3b   :  { %568 = vmatprep.mubr.msk.bf16.mxu1 %vm731_vm0, %v730_v1  ;;  %562 = vmatprep.mubr.msk.bf16.mxu0 %vm731_vm0, %v730_v1  ;;  %v91_v5 = vsel %vm89_vm1, %v616_v3, 0  ;;  %v77_v6 = vld [vmem:[#allocation3] sm:$0x3]  ;;  %v545_v10 = vld [vmem:[%s877_s4] ss:$0 sm:$0xff]  ;;  %s732_s0 = smov 32  }
  0x3c   :  { %567 = vmatpush3.bf16.msra.mxu1 %v615_v2  ;;  %561 = vmatpush3.bf16.msra.mxu0 %v91_v5  ;;  %v192_v28 = vld [vmem:[#allocation7 + $0x8] sm:$0xff]  ;;  %v194_v29 = vld [vmem:[#allocation7 + $0x18] sm:$0xff]  ;;  %v191_v30 = vld [vmem:[#allocation7] sm:$0xff]  ;;  %vm245_vm4 = vcmask 261120   ;;  %vm247_vm5 = vcmask 523264   ;;  %vm361_vm6 = vcmask 254977  }
  0x3d   :  { %v572_v31 = vpack.c.bf16 %v194_v29, %v192_v28  ;;  %v193_v32 = vld [vmem:[#allocation7 + $0x10] sm:$0xff]  ;;  %v196_v33 = vld [vmem:[#allocation7 + $0x28] sm:$0xff]  ;;  %v198_v34 = vld [vmem:[#allocation7 + $0x38] sm:$0xff]  ;;  %vm525_vm7 = vcmask 1040384   ;;  %vm533_vm8 = vcmask 1024  }
  0x3e   :  { %v574_v35 = vpack.c.bf16 %v193_v32, %v191_v30  ;;  %v576_v36 = vpack.c.bf16 %v198_v34, %v196_v33  ;;  %v195_v37 = vld [vmem:[#allocation7 + $0x20] sm:$0xff]  ;;  %v197_v38 = vld [vmem:[#allocation7 + $0x30] sm:$0xff]  ;;  %v200_v39 = vld [vmem:[#allocation7 + $0x48] sm:$0xff] }
  0x3f   :  { %569 = vmatmul.mubr.msk.bf16.vlgmr.msra.gmra.mrb[0].mxu1 %vm139_vm2, %v74_v4  ;;  %563 = vmatmul.mubr.msk.bf16.vlgmr.msra.gmra.mrb[0].mxu0 %vm85_vm3, %v77_v6  ;;  %v202_v40 = vld [vmem:[#allocation7 + $0x58] sm:$0xff]  ;;  %v578_v41 = vpack.c.bf16 %v197_v38, %v195_v37  ;;  %v199_v43 = vld [vmem:[#allocation7 + $0x40] sm:$0xff]  ;;  %v201_v44 = vld [vmem:[#allocation7 + $0x50] sm:$0xff] }
  0x40   :  { %481 = vmatprep.mubr.f32.mxu1 %v730_v1  ;;  %315 = vmatprep.mubr.f32.mxu0 %v730_v1  ;;  %v580_v42 = vpack.c.bf16 %v202_v40, %v200_v39  ;;  %v204_v45 = vld [vmem:[#allocation7 + $0x68] sm:$0xff]  ;;  %v206_v46 = vld [vmem:[#allocation7 + $0x78] sm:$0xff]  ;;  %v582_v47 = vpack.c.bf16 %v201_v44, %v199_v43  ;;  %v203_v49 = vld [vmem:[#allocation7 + $0x60] sm:$0xff] }
  0x41   :  { %573 = vmatprep.subr.bf16.mxu0 %v572_v31  ;;  %589 = vmatprep.subr.bf16.mxu1 %v572_v31  ;;  %v584_v48 = vpack.c.bf16 %v206_v46, %v204_v45  ;;  %v205_v50 = vld [vmem:[#allocation7 + $0x70] sm:$0xff] }
  0x42   :  { %575 = vmatpush1.bf16.msra.mxu0 %v574_v35  ;;  %591 = vmatpush1.bf16.msra.mxu1 %v574_v35  ;;  %v586_v52 = vpack.c.bf16 %v205_v50, %v203_v49  ;;  %v546_v57 = vld [vmem:[%s879_s6] ss:$0 sm:$0xff]  ;;  %s733_s6 = smov 96  }
  0x43   :  { %577 = vmatprep.subr.bf16.mxu0 %v576_v36  ;;  %593 = vmatprep.subr.bf16.mxu1 %v576_v36 }
  0x46   :  { %579 = vmatpush1.bf16.msra.mxu0 %v578_v41  ;;  %595 = vmatpush1.bf16.msra.mxu1 %v578_v41  ;;  %v550_v41 = vld [vmem:[%s880_s7] ss:$0 sm:$0xff] }
  0x47   :  { %581 = vmatprep.subr.bf16.mxu0 %v580_v42  ;;  %597 = vmatprep.subr.bf16.mxu1 %v580_v42 }
  0x4a   :  { %583 = vmatpush1.bf16.msra.mxu0 %v582_v47  ;;  %599 = vmatpush1.bf16.msra.mxu1 %v582_v47 }
  0x4b   :  { %585 = vmatprep.subr.bf16.mxu0 %v584_v48  ;;  %601 = vmatprep.subr.bf16.mxu1 %v584_v48 }
  0x4e   :  { %587 = vmatpush1.bf16.msra.mxu0 %v586_v52  ;;  %603 = vmatpush1.bf16.msra.mxu1 %v586_v52 }
 0x112   :  { %v177_v7 = vpop.f32.mrb[0].mxu1  ;;  %v127_v9 = vpop.f32.mrb[0].mxu0 }
 0x113   :  { %v570_v8 = vpop.f32.mrb[1].mxu1  ;;  %v178_v12 = vadd.f32 %v177_v7, %v127_v9  ;;  %v564_v13 = vpop.f32.mrb[1].mxu0 }
 0x114   :  { %v180_v11 = vpop.f32.mrb[2].mxu1  ;;  %v130_v15 = vpop.f32.mrb[2].mxu0 }
 0x115   :  { %v571_v14 = vpop.f32.mrb[3].mxu1  ;;  %v834_v16 = vadd.f32 %v545_v10, %v178_v12  ;;  %v565_v17 = vpop.f32.mrb[3].mxu0 }
 0x117   :  { %617 = vtanh.f32 %v834_v16  ;;  %v547_v19 = vmul.f32 -1.442695, %v834_v16 }
 0x119   :  { %619 = vpow2.f32 %v547_v19 }
 0x121   :  { %v618_v18 = vpop.eup %617 }
 0x122   :  { %226 = vrot.lane.b32.xlu0 %v618_v18, %s732_s0 }
 0x123   :  { %v620_v20 = vpop.eup %619 }
 0x124   :  { %v220_v21 = vadd.f32 1.0, %v620_v20 }
 0x126   :  { %621 = vrcp.f32 %v220_v21 }
 0x130   :  { %v622_v22 = vpop.eup %621 }
 0x131   :  { %v224_v25 = vmul.f32 0.0, %v622_v22 }
 0x194   :  { %v227_v23 = vpop.permute.xlu0 %226 }
 0x195   :  { %v229_v24 = vmul.f32 %v622_v22, %v227_v23 }
 0x197   :  { %231 = vrot.lane.b32.xlu0 %v229_v24, %s732_s0 }
 0x209   :  { %v232_v26 = vpop.permute.xlu0 %231 }
 0x20a   :  { %v840_v27 = vadd.f32 %v232_v26, %v224_v25 }
 0x20c   :  { %623 = vtanh.f32 %v840_v27  ;;  %v384_v13 = vrot.slane %v840_v27, 6 }
 0x216   :  { %v624_v51 = vpop.eup %623 }
 0x217   :  { %237 = vrot.lane.b32.xlu1 %v624_v51, %s732_s0 }
 0x289   :  { %v238_v53 = vpop.permute.xlu1 %237 }
 0x28a   :  { %v240_v54 = vmul.f32 %v622_v22, %v238_v53 }
 0x28c   :  { %242 = vrot.lane.b32.xlu1 %v240_v54, %s724_s20 }
 0x2fe   :  { %v243_v55 = vpop.permute.xlu1 %242 }
 0x2ff   :  { %v246_v56 = vsel %vm245_vm4, %v243_v55, 0.0 }
 0x300   :  { %548 = vmatmul.mubr.msk.f32.vlgmr.msra.gmra.mrb[4].mxu0 %vm247_vm5, %v246_v56 }
 0x3d3   :  { %v317_v58 = vpop.f32.mrb[4].mxu0 }
 0x3d4   :  { %v373_v59 = vrot.slane %v317_v58, 6  ;;  %v319_v60 = vpop.f32.mrb[5].mxu0 }
 0x3d5   :  { %v322_v61 = vadd.f32 %v546_v57, %v319_v60 }
 0x3d6   :  { %v375_v62 = vadd.f32 %v373_v59, %v834_v16 }
 0x3d7   :  { %625 = vtanh.f32 %v322_v61  ;;  %v549_v1 = vmul.f32 -1.442695, %v322_v61 }
 0x3d8   :  { %627 = vtanh.f32 %v375_v62  ;;  %v552_v2 = vmul.f32 -1.442695, %v375_v62 }
 0x3d9   :  { %629 = vpow2.f32 %v549_v1 }
 0x3da   :  { %631 = vpow2.f32 %v552_v2 }
 0x3e1   :  { %v626_v63 = vpop.eup %625 }
 0x3e2   :  { %v628_v0 = vpop.eup %627  ;;  %332 = vrot.lane.b32.xlu0 %v626_v63, %s732_s0 }
 0x3e3   :  { %388 = vrot.lane.b32.xlu1 %v628_v0, %s732_s0  ;;  %v630_v3 = vpop.eup %629 }
 0x3e4   :  { %v632_v4 = vpop.eup %631  ;;  %v326_v5 = vadd.f32 1.0, %v630_v3 }
 0x3e5   :  { %v379_v6 = vadd.f32 1.0, %v632_v4 }
 0x3e6   :  { %633 = vrcp.f32 %v326_v5 }
 0x3e7   :  { %635 = vrcp.f32 %v379_v6 }
 0x3f0   :  { %v634_v7 = vpop.eup %633 }
 0x3f1   :  { %v636_v9 = vpop.eup %635  ;;  %v330_v14 = vmul.f32 0.0, %v634_v7 }
 0x3f2   :  { %v386_v16 = vmul.f32 %v636_v9, %v384_v13 }
 0x454   :  { %v333_v8 = vpop.permute.xlu0 %332 }
 0x455   :  { %v335_v10 = vmul.f32 %v634_v7, %v333_v8  ;;  %v389_v11 = vpop.permute.xlu1 %388 }
 0x456   :  { %v391_v12 = vmul.f32 %v636_v9, %v389_v11 }
 0x457   :  { %337 = vrot.lane.b32.xlu0 %v335_v10, %s732_s0 }
 0x458   :  { %393 = vrot.lane.b32.xlu1 %v391_v12, %s732_s0 }
 0x4c9   :  { %v338_v15 = vpop.permute.xlu0 %337 }
 0x4ca   :  { %v340_v17 = vadd.f32 %v338_v15, %v330_v14  ;;  %v394_v18 = vpop.permute.xlu1 %393 }
 0x4cb   :  { %v396_v19 = vadd.f32 %v394_v18, %v386_v16 }
 0x4cc   :  { %637 = vtanh.f32 %v340_v17 }
 0x4cd   :  { %639 = vtanh.f32 %v396_v19 }
 0x4d6   :  { %v638_v20 = vpop.eup %637 }
 0x4d7   :  { %v640_v21 = vpop.eup %639  ;;  %343 = vrot.lane.b32.xlu0 %v638_v20, %s732_s0 }
 0x4d8   :  { %399 = vrot.lane.b32.xlu1 %v640_v21, %s732_s0 }
 0x549   :  { %v344_v22 = vpop.permute.xlu0 %343 }
 0x54a   :  { %v346_v23 = vmul.f32 %v634_v7, %v344_v22  ;;  %v400_v24 = vpop.permute.xlu1 %399 }
 0x54b   :  { %v402_v25 = vmul.f32 %v636_v9, %v400_v24 }
 0x54c   :  { %v408_v26 = vrot.slane %v346_v23, 6  ;;  %v347_v47 = vmax.f32 %v346_v23, 0.0 }
 0x54d   :  { %404 = vrot.lane.b32.xlu0 %v402_v25, %s724_s20 }
 0x54e   :  { %409 = vrot.lane.b32.xlu1 %v408_v26, %s733_s6 }
 0x5bf   :  { %v405_v27 = vpop.permute.xlu0 %404 }
 0x5c0   :  { %v410_v28 = vpop.permute.xlu1 %409 }
 0x5c1   :  { %v412_v29 = vsel %vm245_vm4, %v405_v27, %v410_v28 }
 0x5c2   :  { %v414_v30 = vrot.slane %v412_v29, 2 }
 0x5c4   :  { %553 = vmatmul.mubr.msk.f32.vlgmr.msra.gmra.mrb[4].mxu1 %vm247_vm5, %v414_v30 }
 0x697   :  { %v483_v31 = vpop.f32.mrb[4].mxu1 }
 0x698   :  { %v484_v32 = vpop.f32.mrb[5].mxu1 }
 0x699   :  { %v487_v33 = vadd.f32 %v546_v57, %v484_v32  ;;  %v551_v57 = vld [vmem:[#allocation2] ss:$0 sm:$0xff] }
 0x69b   :  { %641 = vtanh.f32 %v487_v33  ;;  %v554_v35 = vmul.f32 -1.442695, %v487_v33 }
 0x69d   :  { %643 = vpow2.f32 %v554_v35 }
 0x6a5   :  { %v642_v34 = vpop.eup %641 }
 0x6a6   :  { %497 = vrot.lane.b32.xlu0 %v642_v34, %s732_s0 }
 0x6a7   :  { %v644_v36 = vpop.eup %643 }
 0x6a8   :  { %v491_v37 = vadd.f32 1.0, %v644_v36 }
 0x6aa   :  { %645 = vrcp.f32 %v491_v37 }
 0x6b4   :  { %v646_v38 = vpop.eup %645 }
 0x6b5   :  { %v495_v42 = vmul.f32 %v646_v38, %v340_v17 }
 0x718   :  { %v498_v39 = vpop.permute.xlu0 %497 }
 0x719   :  { %v500_v40 = vmul.f32 %v646_v38, %v498_v39 }
 0x71b   :  { %502 = vrot.lane.b32.xlu1 %v500_v40, %s732_s0 }
 0x71f   :  { %353 = vrot.lane.b32.xlu1 %v550_v41, %s724_s20 }
 0x78d   :  { %v503_v43 = vpop.permute.xlu1 %502 }
 0x78e   :  { %v505_v44 = vadd.f32 %v503_v43, %v495_v42 }
 0x790   :  { %647 = vtanh.f32 %v505_v44 }
 0x791   :  { %v354_v46 = vpop.permute.xlu1 %353 }
 0x792   :  { %v356_v48 = vmul.f32 %v354_v46, %v347_v47 }
 0x79a   :  { %v648_v45 = vpop.eup %647 }
 0x79b   :  { %508 = vrot.lane.b32.xlu0 %v648_v45, %s732_s0 }
 0x79f   :  { %358 = vrot.lane.b32.xlu0 %v356_v48, %s724_s20 }
 0x80d   :  { %v509_v49 = vpop.permute.xlu0 %508 }
 0x80e   :  { %v511_v50 = vmul.f32 %v646_v38, %v509_v49 }
 0x810   :  { %v512_v51 = vmax.f32 %v511_v50, 0.0 }
 0x811   :  { %v359_v52 = vpop.permute.xlu0 %358 }
 0x812   :  { %v362_v53 = vsel %vm361_vm6, %v359_v52, 0.0  ;;  %v513_v54 = vmul.f32 %v512_v51, %v354_v46 }
 0x813   :  { %363 = vadd.xlane.f32.xlu0 %v362_v53 }
 0x814   :  { %515 = vrot.lane.b32.xlu1 %v513_v54, %s724_s20 }
 0x886   :  { %v516_v55 = vpop.permute.xlu1 %515 }
 0x887   :  { %v518_v56 = vsel %vm361_vm6, %v516_v55, 0.0 }
 0x888   :  { %519 = vadd.xlane.f32.xlu1 %v518_v56 }
 0x8a0   :  { %v364_v58 = vpop.xlane.xlu0 %363 }
 0x8a1   :  { %v371_v59 = vadd.f32 %v551_v57, %v364_v58 }
 0x8a3   :  { %v523_v61 = vrot.slane %v371_v59, 1 }
 0x915   :  { %v520_v60 = vpop.xlane.xlu1 %519 }
 0x916   :  { %v521_v62 = vadd.f32 %v551_v57, %v520_v60 }
 0x918   :  { %v526_v63 = vsel %vm525_vm7, %v523_v61, %v521_v62 }
 0x919   :  { %v555_v0 = vmul.f32 -1.442695, %v526_v63 }
 0x91b   :  { %649 = vpow2.f32 %v555_v0 }
 0x925   :  { %v650_v1 = vpop.eup %649 }
 0x926   :  { %v530_v2 = vadd.f32 1.0, %v650_v1 }
 0x928   :  { %651 = vrcp.f32 %v530_v2 }
 0x932   :  { %v652_v3 = vpop.eup %651 }
 0x933   :  { %534 = vst.msk [vmem:[%s882_s9] sm:$0x3] %vm533_vm8, %v652_v3 }
 0x934   :  { %539 = vsyncpa [#allocation4], 1 }
 0x935   :  { %540 = vsyncpa [#allocation6], 1 }

</bundles_post_ra>
